<compile_context>
chip_gen: v5e
topology: v5e:2x2
jax: 0.10.0
libtpu: 0.0.40
codegen_flags: <defaults>
</compile_context>

<pallas_src>
import jax
import jax.numpy as jnp
from jax import lax
from jax.experimental import pallas as pl
from jax.experimental.pallas import tpu as pltpu


def _vmem_capacity_bytes():
    """Best-effort query of per-core VMEM capacity; None if unavailable."""
    try:
        return int(pltpu.get_tpu_info().vmem_capacity_bytes)
    except Exception:
        return None


def _num_tensorcores_per_chip():
    """2 on v7x (two TensorCores per chip), else 1."""
    try:
        kind = jax.devices()[0].device_kind.lower()
    except Exception:
        return 1
    return 2 if "v7" in kind else 1


def _choose_tiling(B, C, HW, itemsize, vmem_budget_bytes, num_cores):
    """Pick (bt, hw_t, triple_buffer, est_footprint_bytes)."""

    def footprint(bt, hwt, nbuf):
        inputs = 2 * nbuf * bt * C * hwt * itemsize       # two feature streams
        acc = bt * C * C * 4                              # single f32 diff accumulator
        weight = 2 * C * 128 * 4                          # (C,1) tile, lane-padded, 2 bufs
        out = 2 * max(bt, 8) * max(C, 128) * 4            # tiny output tiles, padded
        return inputs + acc + weight + out

    def fits(bt, hwt, nbuf=2):
        return footprint(bt, hwt, nbuf) <= vmem_budget_bytes

    # Spatial tile: whole HW row if it fits (contiguous per-row DMA preferred,
    # especially on v5e); otherwise the largest 128-multiple divisor that fits.
    hw_t = HW
    if not fits(1, HW):
        chosen = None
        for cand in range((HW // 128) * 128, 127, -128):
            if HW % cand == 0 and fits(1, cand):
                chosen = cand
                break
        if chosen is None:
            # Fallback: smallest 128-multiple divisor (minimizes footprint).
            for cand in range(128, HW, 128):
                if HW % cand == 0:
                    chosen = cand
                    break
        hw_t = chosen if chosen is not None else HW
        # TODO(synk): if HW has no 128-multiple divisor and doesn't fit, a padded
        # / masked spatial tail would be needed; not required for target shapes.

    # Batch tile: largest divisor of B that fits VMEM, but keep nb = B/bt >= the
    # number of TensorCores so the "parallel" batch axis can shard on v7x.
    bt_cap = B if B < num_cores else B // num_cores
    bt = 1
    for d in range(max(bt_cap, 1), 0, -1):
        if B % d == 0 and fits(d, hw_t):
            bt = d
            break

    nk = HW // hw_t
    triple = (nk > 2) and fits(bt, hw_t, nbuf=3)
    nbuf = 3 if triple else 2
    return bt, hw_t, triple, footprint(bt, hw_t, nbuf)


def covariance_attention(x, x_tf, fc_weight, fc_bias):
    """x, x_tf: (B, C, H, W); fc_weight: (1, C); fc_bias: (1,). Returns (B, C, 1, 1) f32."""
    B, C, H, W = x.shape
    HW = H * W

    # Keep MXU-native dtypes (f32 / bf16) end-to-end; anything else -> f32,
    # matching the module's cast in get_covariance_matrix.
    if x.dtype not in (jnp.float32, jnp.bfloat16):
        x = x.astype(jnp.float32)
    if x_tf.dtype != x.dtype:
        x_tf = x_tf.astype(x.dtype)
    itemsize = jnp.dtype(x.dtype).itemsize

    vmem_cap = _vmem_capacity_bytes()
    num_cores = _num_tensorcores_per_chip()
    # ~60% of per-core VMEM for tiles (v6e/v5e ~76 MiB, v7x ~38 MiB); conservative
    # 24 MiB if the capacity query is unavailable.
    tile_budget = int(0.6 * vmem_cap) if vmem_cap else 24 * 1024 * 1024

    bt, hw_t, triple, est = _choose_tiling(B, C, HW, itemsize, tile_budget, num_cores)
    nb = B // bt
    nk = HW // hw_t

    # Declare the VMEM we actually need (+25% and +2 MiB Mosaic headroom),
    # clipped below physical capacity, instead of relying on the default
    # scoped limit (16/32 MiB) silently capping tile sizes.
    hard_cap = int(0.9 * vmem_cap) if vmem_cap else 48 * 1024 * 1024
    vmem_limit = int(est * 1.25) + (2 << 20)
    vmem_limit = max(vmem_limit, 32 << 20)
    vmem_limit = min(vmem_limit, hard_cap)

    x_flat = x.reshape(B, C, HW)
    x_tf_flat = x_tf.reshape(B, C, HW)
    # fc weight as a column: the fc reduction then runs along the sublane axis of
    # the symmetric var matrix and the (bt, C) result stays lane-dense.
    w_col = fc_weight.reshape(C, 1).astype(jnp.float32)
    b_smem = fc_bias.reshape(1, 1).astype(jnp.float32)

    # cov - mu = 0.25 * (d s^T + s d^T) / (HW - 1); eps*I and mu cancel exactly.
    half_scale = 0.25 / float(HW - 1)
    dims = (((2,), (2,)), ((0,), (0,)))  # contract spatial axis, batch over bt

    def kernel(x_ref, xtf_ref, w_ref, b_ref, out_ref, acc_ref):
        k = pl.program_id(1)

        @pl.when(k == 0)
        def _init():
            acc_ref[...] = jnp.zeros_like(acc_ref)

        xb = x_ref[...]          # (bt, C, hw_t), native dtype
        xt = xtf_ref[...]        # (bt, C, hw_t)
        d = xb - xt
        s = xb + xt
        # Symmetric difference accumulation on the MXU, f32 accumulator.
        acc_ref[...] += (
            lax.dot_general(d, s, dims, preferred_element_type=jnp.float32)
            + lax.dot_general(s, d, dims, preferred_element_type=jnp.float32)
        )

        @pl.when(k == pl.num_programs(1) - 1)
        def _finalize():
            dm = acc_ref[...] * half_scale            # (bt, C, C) == cov - mu == mu - cov_tf
            w3 = w_ref[...].reshape(1, C, 1)          # (1, C, 1)
            # att[b, c] = sum_d var[b, d, c] * w[d] + bias   (var is symmetric)
            att = jnp.sum((dm * dm) * w3, axis=1) + b_ref[0, 0]   # (bt, C)
            out_ref[0] = jax.nn.sigmoid(att).astype(out_ref.dtype)

    feat_index_map = lambda b, k: (b, 0, k)
    if triple:
        feat_spec = pl.BlockSpec((bt, C, hw_t), feat_index_map,
                                 pipeline_mode=pl.Buffered(3))
    else:
        feat_spec = pl.BlockSpec((bt, C, hw_t), feat_index_map)

    out = pl.pallas_call(
        kernel,
        out_shape=jax.ShapeDtypeStruct((nb, bt, C), jnp.float32),
        grid_spec=pltpu.PrefetchScalarGridSpec(
            num_scalar_prefetch=0,
            grid=(nb, nk),
            in_specs=[
                feat_spec,
                feat_spec,
                pl.BlockSpec((C, 1), lambda b, k: (0, 0)),
                pl.BlockSpec(memory_space=pltpu.MemorySpace.SMEM),
            ],
            out_specs=pl.BlockSpec((1, bt, C), lambda b, k: (b, 0, 0)),
            scratch_shapes=[
                pltpu.VMEM((bt, C, C), jnp.float32),
            ],
        ),
        # TODO(synk): on v7x, verify in the trace that both TensorCores get batch
        # blocks; fall back to pltpu.CORE_PARALLEL / pl.core_map if not.
        compiler_params=pltpu.CompilerParams(
            dimension_semantics=("parallel", "arbitrary"),
            vmem_limit_bytes=vmem_limit,
        ),
    )(x_flat, x_tf_flat, w_col, b_smem)

    return out.reshape(B, C, 1, 1)


def covariance_attention_ref(x, x_tf, fc_weight, fc_bias):
    """Pure-JAX reference mirroring the PyTorch module (full eps/mu formula)."""
    eps = 1e-5
    B, C, H, W = x.shape
    HW = H * W
    eye = jnp.eye(C, dtype=jnp.float32)

    def cov(f):
        f = f.astype(jnp.float32).reshape(B, C, HW)
        return jnp.einsum("bci,bdi->bcd", f, f) / (HW - 1) + eps * eye

    cov_b, cov_t = cov(x), cov(x_tf)
    mu = 0.5 * (cov_b + cov_t)
    var = 0.5 * ((cov_b - mu) ** 2 + (cov_t - mu) ** 2)
    att = jnp.einsum("bcd,d->bc", var, fc_weight[0]) + fc_bias[0]
    return jax.nn.sigmoid(att)[:, :, None, None]


if __name__ == "__main__":
    B, C, H, W = 2, 4, 16, 16

    key = jax.random.PRNGKey(0)
    kx, ktf, kw, kb = jax.random.split(key, 4)

    x = jax.random.normal(kx, (B, C, H, W), dtype=jnp.float32)
    x_tf = x + 0.1 * jax.random.normal(ktf, (B, C, H, W), dtype=jnp.float32)

    # Deterministic "nn.Linear(C, 1)" parameters (uniform in +-1/sqrt(C), like PyTorch init).
    bound = 1.0 / (C ** 0.5)
    fc_weight = jax.random.uniform(kw, (1, C), minval=-bound, maxval=bound, dtype=jnp.float32)
    fc_bias = jax.random.uniform(kb, (1,), minval=-bound, maxval=bound, dtype=jnp.float32)

    out = covariance_attention(x, x_tf, fc_weight, fc_bias)
    out = jax.block_until_ready(out)

    ref = covariance_attention_ref(x, x_tf, fc_weight, fc_bias)
    assert out.shape == (B, C, 1, 1), out.shape
    assert jnp.allclose(out, ref, atol=1e-5, rtol=1e-5), "mismatch vs reference"

    print("KERNEL_OK")
</pallas_src>

<mosaic_0001>
module attributes {stable_mosaic.version = 11 : i64} {
  func.func @kernel(%arg0: i32, %arg1: i32, %arg2: memref<2x4x256xf32, #tpu.memory_space<vmem>>, %arg3: memref<2x4x256xf32, #tpu.memory_space<vmem>>, %arg4: memref<4x1xf32, #tpu.memory_space<vmem>>, %arg5: memref<1x1xf32, #tpu.memory_space<smem>>, %arg6: memref<1x2x4xf32, #tpu.memory_space<vmem>>, %arg7: memref<2x4x4xf32, #tpu.memory_space<vmem>>) attributes {dimension_semantics = [#tpu.dimension_semantics<parallel>, #tpu.dimension_semantics<arbitrary>], iteration_bounds = array<i64: 1, 1>, scalar_prefetch = 0 : i64, scratch_operands = 1 : i64, tpu.core_type = #tpu.core_type<tc>, window_params = [{transform_indices = @transform_0, window_bounds = array<i64: 2, 4, 256>}, {transform_indices = @transform_1, window_bounds = array<i64: 2, 4, 256>}, {pipeline_mode = #tpu.pipeline_mode<synchronous>, transform_indices = @transform_2, window_bounds = array<i64: 4, 1>}, {transform_indices = @transform_3, window_bounds = array<i64: 1, 1>}, {transform_indices = @transform_4, window_bounds = array<i64: 1, 2, 4>}]} {
    %c0_i32 = arith.constant 0 : i32
    %0 = arith.cmpi eq, %arg1, %c0_i32 : i32
    %1 = arith.extui %0 : i1 to i32
    %c0_i32_0 = arith.constant 0 : i32
    %2 = arith.cmpi ne, %1, %c0_i32_0 : i32
    scf.if %2 {
      %cst_15 = arith.constant 0.000000e+00 : f32
      %16 = vector.broadcast %cst_15 : f32 to vector<2x4x4xf32>
      %c0_16 = arith.constant 0 : index
      %c0_17 = arith.constant 0 : index
      %c0_18 = arith.constant 0 : index
      %17 = vector.load %arg7[%c0_16, %c0_17, %c0_18] : memref<2x4x4xf32, #tpu.memory_space<vmem>>, vector<2x4x4xf32>
      tpu.vector_store %arg7[%c0_16, %c0_17, %c0_18], %16 {strides = array<i32>} : memref<2x4x4xf32, #tpu.memory_space<vmem>>, vector<2x4x4xf32>,
    } else {
    }
    %c0 = arith.constant 0 : index
    %c0_1 = arith.constant 0 : index
    %c0_2 = arith.constant 0 : index
    %3 = vector.load %arg2[%c0, %c0_1, %c0_2] : memref<2x4x256xf32, #tpu.memory_space<vmem>>, vector<2x4x256xf32>
    %c0_3 = arith.constant 0 : index
    %c0_4 = arith.constant 0 : index
    %c0_5 = arith.constant 0 : index
    %4 = vector.load %arg3[%c0_3, %c0_4, %c0_5] : memref<2x4x256xf32, #tpu.memory_space<vmem>>, vector<2x4x256xf32>
    %5 = arith.subf %3, %4 : vector<2x4x256xf32>
    %6 = arith.addf %3, %4 : vector<2x4x256xf32>
    %c0_6 = arith.constant 0 : index
    %c0_7 = arith.constant 0 : index
    %c0_8 = arith.constant 0 : index
    %7 = vector.load %arg7[%c0_6, %c0_7, %c0_8] : memref<2x4x4xf32, #tpu.memory_space<vmem>>, vector<2x4x4xf32>
    %cst = arith.constant dense<0.000000e+00> : vector<2x4x4xf32>
    %8 = tpu.matmul %5, %6, %cst {dimension_numbers = #tpu.dot_dimension_numbers<[2], [2], [1], [1], [0, 0, 0, 1, 1, 1], [0], [0]>} : vector<2x4x256xf32>, vector<2x4x256xf32>, vector<2x4x4xf32> -> vector<2x4x4xf32>
    %cst_9 = arith.constant dense<0.000000e+00> : vector<2x4x4xf32>
    %9 = tpu.matmul %6, %5, %cst_9 {dimension_numbers = #tpu.dot_dimension_numbers<[2], [2], [1], [1], [0, 0, 0, 1, 1, 1], [0], [0]>} : vector<2x4x256xf32>, vector<2x4x256xf32>, vector<2x4x4xf32> -> vector<2x4x4xf32>
    %10 = arith.addf %8, %9 : vector<2x4x4xf32>
    %11 = arith.addf %7, %10 : vector<2x4x4xf32>
    %c0_10 = arith.constant 0 : index
    %c0_11 = arith.constant 0 : index
    %c0_12 = arith.constant 0 : index
    %12 = vector.load %arg7[%c0_10, %c0_11, %c0_12] : memref<2x4x4xf32, #tpu.memory_space<vmem>>, vector<2x4x4xf32>
    tpu.vector_store %arg7[%c0_10, %c0_11, %c0_12], %11 {strides = array<i32>} : memref<2x4x4xf32, #tpu.memory_space<vmem>>, vector<2x4x4xf32>,
    %c0_i32_13 = arith.constant 0 : i32
    %13 = arith.cmpi eq, %arg1, %c0_i32_13 : i32
    %14 = arith.extui %13 : i1 to i32
    %c0_i32_14 = arith.constant 0 : i32
    %15 = arith.cmpi ne, %14, %c0_i32_14 : i32
    scf.if %15 {
      %c0_15 = arith.constant 0 : index
      %c0_16 = arith.constant 0 : index
      %c0_17 = arith.constant 0 : index
      %16 = vector.load %arg7[%c0_15, %c0_16, %c0_17] : memref<2x4x4xf32, #tpu.memory_space<vmem>>, vector<2x4x4xf32>
      %cst_18 = arith.constant 9.80392214E-4 : f32
      %17 = vector.broadcast %cst_18 : f32 to vector<2x4x4xf32>
      %18 = arith.mulf %16, %17 : vector<2x4x4xf32>
      %c0_19 = arith.constant 0 : index
      %c0_20 = arith.constant 0 : index
      %19 = vector.load %arg4[%c0_19, %c0_20] : memref<4x1xf32, #tpu.memory_space<vmem>>, vector<4x1xf32>
      %20 = vector.shape_cast %19 : vector<4x1xf32> to vector<1x4x1xf32>
      %21 = arith.mulf %18, %18 : vector<2x4x4xf32>
      %22 = vector.broadcast %20 : vector<1x4x1xf32> to vector<2x4x4xf32>
      %23 = arith.mulf %21, %22 : vector<2x4x4xf32>
      %cst_21 = arith.constant dense<0.000000e+00> : vector<2x4xf32>
      %24 = vector.multi_reduction <add>, %23, %cst_21 [1] : vector<2x4x4xf32> to vector<2x4xf32>
      %c0_22 = arith.constant 0 : index
      %c0_23 = arith.constant 0 : index
      %25 = memref.load %arg5[%c0_22, %c0_23] : memref<1x1xf32, #tpu.memory_space<smem>>
      %26 = vector.broadcast %25 : f32 to vector<2x4xf32>
      %27 = arith.addf %24, %26 : vector<2x4xf32>
      %28 = arith.negf %27 : vector<2x4xf32>
      %29 = math.exp %28 : vector<2x4xf32>
      %cst_24 = arith.constant 1.000000e+00 : f32
      %30 = vector.broadcast %cst_24 : f32 to vector<2x4xf32>
      %31 = arith.addf %30, %29 : vector<2x4xf32>
      %32 = arith.divf %30, %31 : vector<2x4xf32>
      %c0_25 = arith.constant 0 : index
      %c0_26 = arith.constant 0 : index
      %c0_27 = arith.constant 0 : index
      %33 = vector.load %arg6[%c0_25, %c0_26, %c0_27] : memref<1x2x4xf32, #tpu.memory_space<vmem>>, vector<1x2x4xf32>
      %34 = vector.shape_cast %33 : vector<1x2x4xf32> to vector<2x4xf32>
      %35 = vector.shape_cast %32 : vector<2x4xf32> to vector<1x2x4xf32>
      tpu.vector_store %arg6[%c0_25, %c0_26, %c0_27], %35 {strides = array<i32>} : memref<1x2x4xf32, #tpu.memory_space<vmem>>, vector<1x2x4xf32>,
    } else {
    }
    return
  }
  func.func @transform_0(%arg0: i32, %arg1: i32) -> (i32, i32, i32) {
    %c0_i32 = arith.constant 0 : i32
    %c0_i32_0 = arith.constant 0 : i32
    return %arg0, %c0_i32, %arg1 : i32, i32, i32
  }
  func.func @transform_1(%arg0: i32, %arg1: i32) -> (i32, i32, i32) {
    %c0_i32 = arith.constant 0 : i32
    %c0_i32_0 = arith.constant 0 : i32
    return %arg0, %c0_i32, %arg1 : i32, i32, i32
  }
  func.func @transform_2(%arg0: i32, %arg1: i32) -> (i32, i32) {
    %c0_i32 = arith.constant 0 : i32
    %c0_i32_0 = arith.constant 0 : i32
    %c0_i32_1 = arith.constant 0 : i32
    return %c0_i32, %c0_i32_0 : i32, i32
  }
  func.func @transform_3(%arg0: i32, %arg1: i32) -> (i32, i32) {
    %c0_i32 = arith.constant 0 : i32
    %c0_i32_0 = arith.constant 0 : i32
    %c0_i32_1 = arith.constant 0 : i32
    return %c0_i32, %c0_i32_0 : i32, i32
  }
  func.func @transform_4(%arg0: i32, %arg1: i32) -> (i32, i32, i32) {
    %c0_i32 = arith.constant 0 : i32
    %c0_i32_0 = arith.constant 0 : i32
    %c0_i32_1 = arith.constant 0 : i32
    return %arg0, %c0_i32, %c0_i32_0 : i32, i32, i32
  }
}

</mosaic_0001>

<bundles_post_ra>
// kernel: tpu_custom_call.1
= control target key start
LH: loop header
LB: loop body
LE: loop exit
PB: predicated region body
PF: predicated region fallthrough
CT: control target
= control target key end

     0   :  { %10 = vsyncpa [#allocation5], 0  ;;  %s530_s0 = inlined_call_operand.hbm [shape: f32[2,4,256], index: 0, kind: input, shape index: {}]   ;;  %s531_s1 = inlined_call_operand.hbm [shape: f32[2,4,256], index: 1, kind: input, shape index: {}]   ;;  %s532_s2 = inlined_call_operand.vmem [shape: f32[4,1], index: 2, kind: input, shape index: {}]   ;;  %s533_s3 = inlined_call_operand.<no memory space> [shape: f32[1,1], index: 3, kind: input, shape index: {}]   ;;  %s534_s4 = inlined_call_operand.hbm [shape: f32[1,2,4], index: 4, kind: output, shape index: {}]  }
   0x1   :  { %11 = vsyncpa [#allocation8], 0 }
   0x2   :  { %12 = vsyncpa [#allocation6], 0  ;;  %s17_s17 = sshll.u32 %s530_s0, 4  ;;  %s471_s18 = smov [#allocation4]   ;;  %s18_s17 = int_to_ptr.hbm [resolvable:$true] %s17_s17 }
   0x3   :  { %s19_s19 = sshll.u32 %s471_s18, 4  ;;  %s30_s22 = sshll.u32 %s531_s1, 4  ;;  %s20_s19 = int_to_ptr.vmem [resolvable:$true] %s19_s19  ;;  %s31_s22 = int_to_ptr.hbm [resolvable:$true] %s30_s22 }
   0x4   :  { %s472_s23 = smov 128   ;;  %s473_s24 = smov 8  }
   0x5   :  { %25 = dma.hbm_to_vmem [thread:$0]  %s18_s17, 256, %s20_s19, [#allocation5], %s472_s23, %s472_s23, %s473_s24  }
   0x6   :  { %s474_s25 = smov [#allocation7]  }
   0x7   :  { %s32_s26 = sshll.u32 %s474_s25, 4  ;;  %s33_s26 = int_to_ptr.vmem [resolvable:$true] %s32_s26 }
   0x8   :  { %38 = dma.hbm_to_vmem [thread:$0]  %s31_s22, 256, %s33_s26, [#allocation8], %s472_s23, %s472_s23, %s473_s24  }
   0x9   :  { %465 = dma.done.wait [#allocation5], 256  }
   0xa   :  { %466 = vsyncadd [#allocation5], 4294967040 }
   0xb   :  { %467 = dma.done.wait [#allocation8], 256  }
   0xc   :  { %468 = vsyncadd [#allocation8], 4294967040  ;;  %v58_v0 = vld [vmem:[#allocation4] sm:$0xff]  ;;  %v60_v1 = vld [vmem:[#allocation7] sm:$0xff]  ;;  %v475_v17 = vmov 0   ;;  %vm55_vm0 = vcmask 27648   ;;  %v309_v57 = vstv %s533_s3 }
   0xd   :  { %v64_v2 = vadd.f32 %v60_v1, %v58_v0  ;;  %v62_v3 = vsub.f32 %v58_v0, %v60_v1  ;;  %v59_v6 = vld [vmem:[#allocation4 + $0x8] sm:$0xff]  ;;  %v61_v7 = vld [vmem:[#allocation7 + $0x8] sm:$0xff]  ;;  %v284_v16 = vld [vmem:[%s532_s2] sm:$0xf]  ;;  %384 = vset.pattern.permute.xlu0 %v475_v17  ;;  %v476_v26 = vmov 0.0   ;;  %s477_s3 = smov [#allocation9]  }
   0xe   :  { %v65_v8 = vadd.f32 %v61_v7, %v59_v6  ;;  %v63_v11 = vsub.f32 %v59_v6, %v61_v7  ;;  %289 = vperm.xlu0 %384, %v284_v16   ;;  %56 = vst.msk [vmem:[#allocation2] sm:$0xf] %vm55_vm0, %v476_v26  ;;  %s362_s28 = sshll.u32 %s477_s3, 4  ;;  %s364_s5 = sshll.u32 %s534_s4, 4  ;;  %vm352_vm7 = vcmask 1041409   ;;  %vm355_vm10 = vcmask 25600   ;;  %s363_s28 = int_to_ptr.vmem [resolvable:$true] %s362_s28  ;;  %s365_s5 = int_to_ptr.hbm [resolvable:$true] %s364_s5 }
   0xf   :  { %69 = vst [vmem:[#allocation1] ss:$2 sm:$0xff] %v64_v2 }
  0x10   :  { %57 = vst.msk [vmem:[#allocation2 + $0x4] sm:$0xf] %vm55_vm0, %v476_v26 }
  0x15   :  { %v66_v33 = vld [vmem:[#allocation2] sm:$0xf] }
  0x16   :  { %v70_v4 = vld.sshfl [vmem:[#allocation1] sm:$0xff pattern:$0x75316420]  ;;  %v71_v5 = vld.sshfl [vmem:[#allocation1 + $0x8] sm:$0xff pattern:$0x75316420] }
  0x17   :  { %75 = vst [vmem:[#allocation1] ss:$2 sm:$0xff] %v62_v3  ;;  %v67_v50 = vld [vmem:[#allocation2 + $0x4] sm:$0xf] }
  0x1e   :  { %v76_v9 = vld.sshfl [vmem:[#allocation1] sm:$0xff pattern:$0x75316420]  ;;  %v77_v10 = vld.sshfl [vmem:[#allocation1 + $0x8] sm:$0xff pattern:$0x75316420] }
  0x1f   :  { %95 = vmatpush.xpose.msra.mxu0 %v76_v9  ;;  %115 = vmatpush.xpose.msra.mxu1 %v77_v10  ;;  %121 = vst [vmem:[#allocation1] ss:$2 sm:$0xff] %v65_v8 }
  0x22   :  { %96 = vmatmul.f32.vlgmr.msra.gmra.mxu0 %v70_v4  ;;  %116 = vmatmul.f32.vlgmr.msra.gmra.mxu1 %v71_v5 }
  0x26   :  { %v122_v12 = vld.sshfl [vmem:[#allocation1] sm:$0xff pattern:$0x75316420]  ;;  %v123_v13 = vld.sshfl [vmem:[#allocation1 + $0x8] sm:$0xff pattern:$0x75316420] }
  0x27   :  { %127 = vst [vmem:[#allocation1] ss:$2 sm:$0xff] %v63_v11 }
  0x2e   :  { %v128_v14 = vld.sshfl [vmem:[#allocation1] sm:$0xff pattern:$0x75316420]  ;;  %v129_v15 = vld.sshfl [vmem:[#allocation1 + $0x8] sm:$0xff pattern:$0x75316420] }
  0x2f   :  { %172 = vst [vmem:[#allocation1] ss:$2 sm:$0xff] %v62_v3  ;;  %147 = vmatpush.xpose.msra.mxu2 %v128_v14  ;;  %167 = vmatpush.xpose.msra.mxu3 %v129_v15 }
  0x32   :  { %148 = vmatmul.f32.vlgmr.msra.gmra.mxu2 %v122_v12  ;;  %168 = vmatmul.f32.vlgmr.msra.gmra.mxu3 %v123_v13 }
  0x36   :  { %v173_v18 = vld.sshfl [vmem:[#allocation1] sm:$0xff pattern:$0x75316420]  ;;  %v174_v19 = vld.sshfl [vmem:[#allocation1 + $0x8] sm:$0xff pattern:$0x75316420] }
  0x37   :  { %177 = vst [vmem:[#allocation1] ss:$2 sm:$0xff] %v64_v2 }
  0x3e   :  { %v178_v20 = vld.sshfl [vmem:[#allocation1] sm:$0xff pattern:$0x75316420]  ;;  %v179_v21 = vld.sshfl [vmem:[#allocation1 + $0x8] sm:$0xff pattern:$0x75316420] }
  0x3f   :  { %197 = vmatpush.xpose.msrb.mxu0 %v178_v20  ;;  %217 = vmatpush.xpose.msrb.mxu1 %v179_v21  ;;  %222 = vst [vmem:[#allocation1] ss:$2 sm:$0xff] %v63_v11 }
  0x42   :  { %198 = vmatmul.f32.vlgmr.msrb.gmra.mxu0 %v173_v18  ;;  %218 = vmatmul.f32.vlgmr.msrb.gmra.mxu1 %v174_v19 }
  0x46   :  { %v223_v22 = vld.sshfl [vmem:[#allocation1] sm:$0xff pattern:$0x75316420]  ;;  %v224_v23 = vld.sshfl [vmem:[#allocation1 + $0x8] sm:$0xff pattern:$0x75316420] }
  0x47   :  { %227 = vst [vmem:[#allocation1] ss:$2 sm:$0xff] %v65_v8 }
  0x4e   :  { %v228_v24 = vld.sshfl [vmem:[#allocation1] sm:$0xff pattern:$0x75316420]  ;;  %v229_v25 = vld.sshfl [vmem:[#allocation1 + $0x8] sm:$0xff pattern:$0x75316420] }
  0x4f   :  { %247 = vmatpush.xpose.msrb.mxu2 %v228_v24  ;;  %267 = vmatpush.xpose.msrb.mxu3 %v229_v25 }
  0x52   :  { %248 = vmatmul.f32.vlgmr.msrb.gmra.mxu2 %v223_v22  ;;  %268 = vmatmul.f32.vlgmr.msrb.gmra.mxu3 %v224_v23 }
  0x80   :  { %v290_v40 = vpop.permute.xlu0 %289 }
  0x9f   :  { %v97_v27 = vpop.f32.mrf.mxu0  ;;  %v117_v28 = vpop.f32.mrf.mxu1 }
  0xa0   :  { %v118_v29 = vadd.f32 %v117_v28, %v97_v27 }
  0xb5   :  { %v149_v36 = vpop.f32.mrf.mxu2  ;;  %v169_v37 = vpop.f32.mrf.mxu3 }
  0xb6   :  { %v170_v43 = vadd.f32 %v169_v37, %v149_v36 }
  0xbf   :  { %v199_v30 = vpop.f32.mrf.mxu0  ;;  %v219_v31 = vpop.f32.mrf.mxu1 }
  0xc0   :  { %v200_v32 = vadd.f32 %v199_v30, %v118_v29 }
  0xc2   :  { %v220_v34 = vadd.f32 %v219_v31, %v200_v32 }
  0xc4   :  { %v272_v35 = vadd.f32 %v220_v34, %v66_v33 }
  0xc6   :  { %275 = vst.msk [vmem:[#allocation2] sm:$0xf] %vm55_vm0, %v272_v35 }
  0xcd   :  { %v280_v38 = vld [vmem:[#allocation2] sm:$0xf] }
  0xce   :  { %v282_v39 = vmul.f32 0.0009803922, %v280_v38 }
  0xd0   :  { %v285_v41 = vmul.f32 %v282_v39, %v282_v39 }
  0xd2   :  { %v292_v42 = vmul.f32 %v290_v40, %v285_v41 }
  0xd4   :  { %v294_v44 = vsel %vm55_vm0, %v292_v42, 0.0 }
  0xd5   :  { %v295_v45 = vrot.slane %v294_v44, 4  ;;  %v249_v46 = vpop.f32.mrf.mxu2  ;;  %v269_v47 = vpop.f32.mrf.mxu3 }
  0xd6   :  { %v250_v48 = vadd.f32 %v249_v46, %v170_v43 }
  0xd7   :  { %v296_v49 = vadd.f32 %v295_v45, %v294_v44 }
  0xd8   :  { %v270_v51 = vadd.f32 %v269_v47, %v250_v48 }
  0xd9   :  { %v297_v52 = vrot.slane %v296_v49, 2 }
  0xda   :  { %v273_v53 = vadd.f32 %v270_v51, %v67_v50 }
  0xdb   :  { %v298_v54 = vadd.f32 %v297_v52, %v296_v49 }
  0xdc   :  { %276 = vst.msk [vmem:[#allocation2 + $0x4] sm:$0xf] %vm55_vm0, %v273_v53 }
  0xdd   :  { %v299_v55 = vrot.slane %v298_v54, 1 }
  0xdf   :  { %v300_v56 = vadd.f32 %v299_v55, %v298_v54 }
  0xe1   :  { %v310_v58 = vadd.f32 %v309_v57, %v300_v56 }
  0xe3   :  { %v281_v59 = vld [vmem:[#allocation2 + $0x4] sm:$0xf]  ;;  %v375_v62 = vmul.f32 -1.442695, %v310_v58 }
  0xe4   :  { %v283_v60 = vmul.f32 0.0009803922, %v281_v59 }
  0xe5   :  { %385 = vpow2.f32 %v375_v62 }
  0xe6   :  { %v286_v61 = vmul.f32 %v283_v60, %v283_v60 }
  0xe8   :  { %v293_v63 = vmul.f32 %v290_v40, %v286_v61 }
  0xea   :  { %v301_v0 = vsel %vm55_vm0, %v293_v63, 0.0 }
  0xeb   :  { %v302_v1 = vrot.slane %v301_v0, 4  ;;  %v386_v4 = vpop.eup %385 }
  0xec   :  { %v318_v7 = vadd.f32 1.0, %v386_v4 }
  0xed   :  { %v303_v2 = vadd.f32 %v302_v1, %v301_v0 }
  0xee   :  { %387 = vrcp.f32 %v318_v7  ;;  %vm325_vm1 = vweird.f32 %v318_v7  ;;  %v331_v21 = vand.u32 2147483648, %v318_v7  ;;  %v329_v23 = vand.u32 2147483647, %v318_v7 }
  0xef   :  { %v304_v3 = vrot.slane %v303_v2, 2 }
  0xf0   :  { %v332_v29 = vor.u32 1.1754944e-38, %v331_v21  ;;  %vm330_vm8 = vcmp.eq.f32.partialorder %v329_v23, 8.507059e+37 }
  0xf1   :  { %v305_v5 = vadd.f32 %v304_v3, %v303_v2 }
  0xf3   :  { %v306_v6 = vrot.slane %v305_v5, 1 }
  0xf4   :  { %v388_v11 = vpop.eup %387 }
  0xf5   :  { %v307_v8 = vadd.f32 %v306_v6, %v305_v5  ;;  %v321_v13 = vmul.f32 %v388_v11, %v318_v7  ;;  %vm326_vm2 = vweird.f32 %v388_v11 }
  0xf6   :  { %vm521_vm4 = vmor %vm325_vm1, %vm326_vm2 }
  0xf7   :  { %v311_v9 = vadd.f32 %v309_v57, %v307_v8  ;;  %v322_v15 = vsub.f32 1.0, %v321_v13 }
  0xf9   :  { %v376_v10 = vmul.f32 -1.442695, %v311_v9  ;;  %v323_v16 = vmul.f32 %v388_v11, %v322_v15 }
  0xfb   :  { %389 = vpow2.f32 %v376_v10  ;;  %v324_v19 = vadd.f32 %v388_v11, %v323_v16 }
  0xfd   :  { %v328_v27 = vsel %vm521_vm4, %v388_v11, %v324_v19 }
  0xfe   :  { %v333_v32 = vsel %vm330_vm8, %v332_v29, %v328_v27 }
 0x101   :  { %v390_v12 = vpop.eup %389 }
 0x102   :  { %v319_v14 = vadd.f32 1.0, %v390_v12 }
 0x104   :  { %391 = vrcp.f32 %v319_v14  ;;  %v346_v22 = vand.u32 2147483648, %v319_v14  ;;  %v344_v25 = vand.u32 2147483647, %v319_v14  ;;  %vm340_vm5 = vweird.f32 %v319_v14 }
 0x106   :  { %v347_v30 = vor.u32 1.1754944e-38, %v346_v22  ;;  %vm345_vm9 = vcmp.eq.f32.partialorder %v344_v25, 8.507059e+37 }
 0x10a   :  { %v392_v17 = vpop.eup %391 }
 0x10b   :  { %v336_v18 = vmul.f32 %v392_v17, %v319_v14  ;;  %vm341_vm3 = vweird.f32 %v392_v17 }
 0x10c   :  { %vm342_vm6 = vmor %vm340_vm5, %vm341_vm3 }
 0x10d   :  { %v337_v20 = vsub.f32 1.0, %v336_v18 }
 0x10f   :  { %v338_v24 = vmul.f32 %v392_v17, %v337_v20 }
 0x111   :  { %v339_v28 = vadd.f32 %v392_v17, %v338_v24 }
 0x113   :  { %v343_v31 = vsel %vm342_vm6, %v392_v17, %v339_v28 }
 0x114   :  { %v348_v33 = vsel %vm345_vm9, %v347_v30, %v343_v31 }
 0x115   :  { %v353_v34 = vsel %vm352_vm7, %v348_v33, %v333_v32 }
 0x116   :  { %356 = vst.msk [vmem:[#allocation9] sm:$0x3] %vm355_vm10, %v353_v34 }
 0x117   :  { %367 = dma.vmem_to_hbm [thread:$0]  %s363_s28, 32, %s365_s5, [#allocation6]  }
 0x118   :  { %469 = dma.done.wait [#allocation6], 32  }
 0x119   :  { %470 = vsyncadd [#allocation6], 4294967264 }
 0x11a   :  { %372 = vsyncpa [#allocation5], 1 }
 0x11b   :  { %373 = vsyncpa [#allocation8], 1 }
 0x11c   :  { %374 = vsyncpa [#allocation6], 1 }

</bundles_post_ra>
